<compile_context>
chip_gen: v7x
topology: tpu7x:2x2x1
jax: 0.10.0
libtpu: 0.0.40
codegen_flags: <defaults>
</compile_context>

<pallas_src>
import jax
import jax.numpy as jnp
from jax.experimental import pallas as pl
from jax.experimental.pallas import tpu as pltpu

HIDDEN = 256     # first Linear width
OUT = 10         # second Linear width (real)
OUT_PAD = 128    # lane-dense padded output width


def mlp_kernel(x_ref, w1_ref, b1_ref, w2_ref, b2_ref, o_ref):
    # x_ref: (TB, D) f32  | w1_ref: (D, 256) bf16 | b1_ref: (1, 256) f32
    # w2_ref: (256, 128) bf16 (cols 10..127 zero)  | b2_ref: (1, 128) f32
    x = x_ref[...].astype(jnp.bfloat16)                    # in-kernel cast (VPU, free-ish)
    h = jnp.dot(x, w1_ref[...], preferred_element_type=jnp.float32)
    h = jnp.maximum(h + b1_ref[...], 0.0)                  # bias + ReLU in f32
    h = h.astype(jnp.bfloat16)                             # bf16 for 2nd MXU pass
    y = jnp.dot(h, w2_ref[...], preferred_element_type=jnp.float32)
    o_ref[...] = (y + b2_ref[...]).astype(o_ref.dtype)     # lane-dense (TB, 128) store


def _round_up(a, m):
    return ((a + m - 1) // m) * m


def mlp_forward(x_nchw, w1, b1, w2, b2):
    """x_nchw: (B, C, H, W) float32. Returns (B, 10) float32."""
    B = x_nchw.shape[0]
    x2d = x_nchw.reshape(B, -1)            # nn.Flatten; metadata-only, stays f32
    D = x2d.shape[1]

    # Batch tile: >= 8 rows (full vreg sublanes), capped at 512.
    TB = min(512, _round_up(B, 8))
    # v7x has 2 TensorCores: make sure the "parallel" batch axis has enough
    # grid steps to feed both when the batch allows it (no-op on v5e/v6e).
    if B >= 32 and pl.cdiv(B, TB) < 4:
        TB = max(8, _round_up(pl.cdiv(B, 4), 8))
    grid = (pl.cdiv(B, TB),)

    # Weights: bf16, pre-transposed (in, out). Output width zero-padded to 128.
    w1b = w1.astype(jnp.bfloat16)
    w2p = jnp.zeros((HIDDEN, OUT_PAD), jnp.bfloat16).at[:, :OUT].set(
        w2.astype(jnp.bfloat16))
    b1_2d = b1.reshape(1, HIDDEN).astype(jnp.float32)
    b2p = jnp.zeros((1, OUT_PAD), jnp.float32).at[0, :OUT].set(
        b2.astype(jnp.float32))

    b_cov = grid[0] * TB                   # batch rows actually computed
    cost = pl.CostEstimate(
        flops=2 * b_cov * D * HIDDEN + 2 * b_cov * HIDDEN * OUT_PAD,
        transcendentals=0,
        bytes_accessed=(x2d.size * 4 + w1b.size * 2 + w2p.size * 2
                        + b1_2d.size * 4 + b2p.size * 4
                        + B * OUT_PAD * 4),
    )

    out = pl.pallas_call(
        mlp_kernel,
        out_shape=jax.ShapeDtypeStruct((B, OUT_PAD), jnp.float32),
        grid_spec=pltpu.PrefetchScalarGridSpec(
            num_scalar_prefetch=0,
            grid=grid,
            in_specs=[
                pl.BlockSpec((TB, D), lambda i: (i, 0)),           # x: tiled over batch
                pl.BlockSpec((D, HIDDEN), lambda i: (0, 0)),       # w1: VMEM-resident
                pl.BlockSpec((1, HIDDEN), lambda i: (0, 0)),       # b1: VMEM-resident
                pl.BlockSpec((HIDDEN, OUT_PAD), lambda i: (0, 0)), # w2: VMEM-resident
                pl.BlockSpec((1, OUT_PAD), lambda i: (0, 0)),      # b2: VMEM-resident
            ],
            out_specs=pl.BlockSpec((TB, OUT_PAD), lambda i: (i, 0)),
        ),
        compiler_params=pltpu.CompilerParams(
            dimension_semantics=("parallel",),                     # megacore on v7x
        ),
        cost_estimate=cost,
    )(x2d, w1b, b1_2d, w2p, b2p)

    return out[:, :OUT]


def init_params(key, input_num, hidden=HIDDEN, out=OUT):
    """Deterministic init mimicking PyTorch's U(-1/sqrt(fan_in), 1/sqrt(fan_in))."""
    k1, k2, k3, k4 = jax.random.split(key, 4)
    bound1 = 1.0 / jnp.sqrt(input_num)
    bound2 = 1.0 / jnp.sqrt(hidden)
    # Stored as (in_features, out_features) == W.T of the PyTorch layer.
    w1 = jax.random.uniform(k1, (input_num, hidden), jnp.float32, -bound1, bound1)
    b1 = jax.random.uniform(k2, (hidden,), jnp.float32, -bound1, bound1)
    w2 = jax.random.uniform(k3, (hidden, out), jnp.float32, -bound2, bound2)
    b2 = jax.random.uniform(k4, (out,), jnp.float32, -bound2, bound2)
    return w1, b1, w2, b2


if __name__ == "__main__":
    key = jax.random.PRNGKey(0)
    kx, kp = jax.random.split(key)

    # Small NCHW input: batch=2, channels=4, spatial=16x16 -> input_num = 1024.
    B, C, H, W = 2, 4, 16, 16
    input_num = C * H * W
    x = jax.random.normal(kx, (B, C, H, W), jnp.float32)

    w1, b1, w2, b2 = init_params(kp, input_num)

    y = mlp_forward(x, w1, b1, w2, b2)
    y = jax.block_until_ready(y)
    assert y.shape == (B, OUT)

    # Mixed-precision pure-JAX reference (same bf16 casts / f32 accumulation).
    x2d = x.reshape(B, -1)
    xb = x2d.astype(jnp.bfloat16)
    w1b = w1.astype(jnp.bfloat16)
    w2b = w2.astype(jnp.bfloat16)
    h_ref = jnp.maximum(
        jnp.dot(xb, w1b, preferred_element_type=jnp.float32) + b1, 0.0)
    ref = jnp.dot(h_ref.astype(jnp.bfloat16), w2b,
                  preferred_element_type=jnp.float32) + b2
    assert jnp.allclose(y, ref, atol=1e-2, rtol=1e-2)

    # Coarse sanity check against the full-f32 PyTorch math.
    ref_f32 = jnp.maximum(x2d @ w1 + b1, 0.0) @ w2 + b2
    assert jnp.allclose(y, ref_f32, atol=5e-2, rtol=5e-2)

    print("KERNEL_OK")
</pallas_src>

<mosaic_0001>
module attributes {stable_mosaic.version = 11 : i64} {
  func.func @mlp_kernel(%arg0: i32, %arg1: memref<8x1024xf32, #tpu.memory_space<vmem>>, %arg2: memref<1024x256xbf16, #tpu.memory_space<vmem>>, %arg3: memref<1x256xf32, #tpu.memory_space<vmem>>, %arg4: memref<256x128xbf16, #tpu.memory_space<vmem>>, %arg5: memref<1x128xf32, #tpu.memory_space<vmem>>, %arg6: memref<8x128xf32, #tpu.memory_space<vmem>>) attributes {dimension_semantics = [#tpu.dimension_semantics<parallel>], iteration_bounds = array<i64: 1>, scalar_prefetch = 0 : i64, scratch_operands = 0 : i64, tpu.core_type = #tpu.core_type<tc>, window_params = [{transform_indices = @transform_0, window_bounds = array<i64: 8, 1024>}, {pipeline_mode = #tpu.pipeline_mode<synchronous>, transform_indices = @transform_1, window_bounds = array<i64: 1024, 256>}, {pipeline_mode = #tpu.pipeline_mode<synchronous>, transform_indices = @transform_2, window_bounds = array<i64: 1, 256>}, {pipeline_mode = #tpu.pipeline_mode<synchronous>, transform_indices = @transform_3, window_bounds = array<i64: 256, 128>}, {pipeline_mode = #tpu.pipeline_mode<synchronous>, transform_indices = @transform_4, window_bounds = array<i64: 1, 128>}, {transform_indices = @transform_5, window_bounds = array<i64: 8, 128>}]} {
    %c0 = arith.constant 0 : index
    %c0_0 = arith.constant 0 : index
    %0 = vector.load %arg1[%c0, %c0_0] : memref<8x1024xf32, #tpu.memory_space<vmem>>, vector<8x1024xf32>
    %1 = arith.truncf %0 : vector<8x1024xf32> to vector<8x1024xbf16>
    %c0_1 = arith.constant 0 : index
    %c0_2 = arith.constant 0 : index
    %2 = vector.load %arg2[%c0_1, %c0_2] : memref<1024x256xbf16, #tpu.memory_space<vmem>>, vector<1024x256xbf16>
    %cst = arith.constant dense<0.000000e+00> : vector<8x256xf32>
    %3 = tpu.matmul %1, %2, %cst {dimension_numbers = #tpu.dot_dimension_numbers<[1], [0], [0], [1], [0, 0, 1, 1], [], []>} : vector<8x1024xbf16>, vector<1024x256xbf16>, vector<8x256xf32> -> vector<8x256xf32>
    %c0_3 = arith.constant 0 : index
    %c0_4 = arith.constant 0 : index
    %4 = vector.load %arg3[%c0_3, %c0_4] : memref<1x256xf32, #tpu.memory_space<vmem>>, vector<1x256xf32>
    %5 = vector.broadcast %4 : vector<1x256xf32> to vector<8x256xf32>
    %6 = arith.addf %3, %5 : vector<8x256xf32>
    %cst_5 = arith.constant 0.000000e+00 : f32
    %7 = vector.broadcast %cst_5 : f32 to vector<8x256xf32>
    %8 = arith.maximumf %6, %7 : vector<8x256xf32>
    %9 = arith.truncf %8 : vector<8x256xf32> to vector<8x256xbf16>
    %c0_6 = arith.constant 0 : index
    %c0_7 = arith.constant 0 : index
    %10 = vector.load %arg4[%c0_6, %c0_7] : memref<256x128xbf16, #tpu.memory_space<vmem>>, vector<256x128xbf16>
    %cst_8 = arith.constant dense<0.000000e+00> : vector<8x128xf32>
    %11 = tpu.matmul %9, %10, %cst_8 {dimension_numbers = #tpu.dot_dimension_numbers<[1], [0], [0], [1], [0, 0, 1, 1], [], []>} : vector<8x256xbf16>, vector<256x128xbf16>, vector<8x128xf32> -> vector<8x128xf32>
    %c0_9 = arith.constant 0 : index
    %c0_10 = arith.constant 0 : index
    %12 = vector.load %arg5[%c0_9, %c0_10] : memref<1x128xf32, #tpu.memory_space<vmem>>, vector<1x128xf32>
    %13 = vector.broadcast %12 : vector<1x128xf32> to vector<8x128xf32>
    %14 = arith.addf %11, %13 : vector<8x128xf32>
    %c0_11 = arith.constant 0 : index
    %c0_12 = arith.constant 0 : index
    %15 = vector.load %arg6[%c0_11, %c0_12] : memref<8x128xf32, #tpu.memory_space<vmem>>, vector<8x128xf32>
    tpu.vector_store %arg6[%c0_11, %c0_12], %14 {strides = array<i32>} : memref<8x128xf32, #tpu.memory_space<vmem>>, vector<8x128xf32>,
    return
  }
  func.func @transform_0(%arg0: i32) -> (i32, i32) {
    %c0_i32 = arith.constant 0 : i32
    %c0_i32_0 = arith.constant 0 : i32
    return %arg0, %c0_i32 : i32, i32
  }
  func.func @transform_1(%arg0: i32) -> (i32, i32) {
    %c0_i32 = arith.constant 0 : i32
    %c0_i32_0 = arith.constant 0 : i32
    %c0_i32_1 = arith.constant 0 : i32
    return %c0_i32, %c0_i32_0 : i32, i32
  }
  func.func @transform_2(%arg0: i32) -> (i32, i32) {
    %c0_i32 = arith.constant 0 : i32
    %c0_i32_0 = arith.constant 0 : i32
    %c0_i32_1 = arith.constant 0 : i32
    return %c0_i32, %c0_i32_0 : i32, i32
  }
  func.func @transform_3(%arg0: i32) -> (i32, i32) {
    %c0_i32 = arith.constant 0 : i32
    %c0_i32_0 = arith.constant 0 : i32
    %c0_i32_1 = arith.constant 0 : i32
    return %c0_i32, %c0_i32_0 : i32, i32
  }
  func.func @transform_4(%arg0: i32) -> (i32, i32) {
    %c0_i32 = arith.constant 0 : i32
    %c0_i32_0 = arith.constant 0 : i32
    %c0_i32_1 = arith.constant 0 : i32
    return %c0_i32, %c0_i32_0 : i32, i32
  }
  func.func @transform_5(%arg0: i32) -> (i32, i32) {
    %c0_i32 = arith.constant 0 : i32
    %c0_i32_0 = arith.constant 0 : i32
    return %arg0, %c0_i32 : i32, i32
  }
}

</mosaic_0001>

<bundles_post_ra>
// kernel: tpu_custom_call.1
= control target key start
LH: loop header
LB: loop body
LE: loop exit
PB: predicated region body
PF: predicated region fallthrough
CT: control target
= control target key end

     0   :  { %10 = vsyncpa [#allocation3], 0  ;;  %s1933_s0 = inlined_call_operand.hbm [shape: f32[2,1024], index: 0, kind: input, shape index: {}]   ;;  %s1934_s1 = inlined_call_operand.hbm [shape: bf16[1024,256], index: 1, kind: input, shape index: {}]   ;;  %s1935_s2 = inlined_call_operand.vmem [shape: f32[1,256], index: 2, kind: input, shape index: {}]   ;;  %s1936_s3 = inlined_call_operand.hbm [shape: bf16[256,128], index: 3, kind: input, shape index: {}]   ;;  %s1937_s4 = inlined_call_operand.vmem [shape: f32[1,128], index: 4, kind: input, shape index: {}]   ;;  %s1938_s5 = inlined_call_operand.hbm [shape: f32[2,128], index: 5, kind: output, shape index: {}]  }
   0x1   :  { %11 = vsyncpa [#allocation6], 0 }
   0x2   :  { %12 = vsyncpa [#allocation4], 0 }
   0x3   :  { %17 = vsyncadd [#allocation3], 768  ;;  %s1815_s18 = smov [#allocation5]   ;;  %s1721_s22 = scalar_lea.hbm %s1934_s1, 16384 }
   0x4   :  { %s30_s19 = sshll.u32 %s1815_s18, 4  ;;  %p1722_p0 = scmp.ne.s32.totalorder %s1934_s1, %s1721_s22  ;;  %s31_s19 = int_to_ptr.vmem [resolvable:$true] %s30_s19 }
   0x5   :  { %p1725_p1 = scmp.lt.u32.totalorder %s1721_s22, %s1934_s1 }
   0x7   :  { %p1727_p2 = pnand %p1725_p1, %p1722_p0 }
   0x9   :  { %1730 = shalt.err (!%p1727_p2)
}
   0xa   :  { %s1731_s27 = scalar_lea.vmem %s31_s19, 16384  ;;  %p1736_p4 = scmp.lt.s32.totalorder %s31_s19, %s31_s19 }
   0xb   :  { %p1732_p3 = scmp.ne.s32.totalorder %s31_s19, %s1731_s27  ;;  %p1737_p5 = scmp.lt.s32.totalorder %s1731_s27, %s1731_s27 }
   0xd   :  { %p1738_p6 = por %p1737_p5, %p1736_p4 }
   0xf   :  { %p1739_p7 = pnand %p1738_p6, %p1732_p3 }
  0x11   :  { %1742 = shalt.err (!%p1739_p7)
}
  0x12   :  { %s1816_s28 = smov 128   ;;  %s1817_s29 = smov 8  }
  0x13   :  { %36 = dma.hbm_to_vmem [thread:$0]  %s1934_s1, 16384, %s31_s19, [#allocation6], %s1816_s28, %s1816_s28, %s1817_s29  }
  0x14   :  { %s1818_s7 = smov [#allocation2]   ;;  %s1743_s11 = scalar_lea.hbm %s1933_s0, 256 }
  0x15   :  { %s18_s8 = sshll.u32 %s1818_s7, 4  ;;  %p1744_p8 = scmp.ne.s32.totalorder %s1933_s0, %s1743_s11  ;;  %s19_s8 = int_to_ptr.vmem [resolvable:$true] %s18_s8 }
  0x16   :  { %p1747_p9 = scmp.lt.u32.totalorder %s1743_s11, %s1933_s0 }
  0x18   :  { %p1749_p10 = pnand %p1747_p9, %p1744_p8 }
  0x1a   :  { %1752 = shalt.err (!%p1749_p10)
}
  0x1b   :  { %s1753_s16 = scalar_lea.vmem %s19_s8, 256  ;;  %s1757_s1 = scalar_lea.vmem %s19_s8, 1024 }
  0x1c   :  { %p1754_p11 = scmp.ne.s32.totalorder %s19_s8, %s1753_s16  ;;  %p1758_p12 = scmp.lt.s32.totalorder %s19_s8, %s19_s8 }
  0x1d   :  { %p1759_p13 = scmp.lt.s32.totalorder %s1757_s1, %s1753_s16 }
  0x1f   :  { %p1760_p0 = por %p1759_p13, %p1758_p12 }
  0x21   :  { %p1761_p1 = pnand %p1760_p0, %p1754_p11 }
  0x23   :  { %1764 = shalt.err (!%p1761_p1)
}
  0x24   :  { %s1819_s17 = smov 256   ;;  %s1820_s18 = smov 16  }
  0x25   :  { %24 = dma.hbm_to_vmem [thread:$0]  %s1933_s0, 256, %s19_s8, [#allocation3], %s1819_s17, %s1819_s17, %s1820_s18  }
  0x26   :  { %s1821_s21 = smov [#allocation7]   ;;  %s1765_s25 = scalar_lea.hbm %s1936_s3, 2048 }
  0x27   :  { %s44_s22 = sshll.u32 %s1821_s21, 4  ;;  %p1766_p2 = scmp.ne.s32.totalorder %s1936_s3, %s1765_s25  ;;  %s45_s22 = int_to_ptr.vmem [resolvable:$true] %s44_s22 }
  0x28   :  { %p1769_p3 = scmp.lt.u32.totalorder %s1765_s25, %s1936_s3 }
  0x2a   :  { %p1771_p4 = pnand %p1769_p3, %p1766_p2 }
  0x2c   :  { %1774 = shalt.err (!%p1771_p4)
}
  0x2d   :  { %s1775_s30 = scalar_lea.vmem %s45_s22, 2048  ;;  %p1780_p6 = scmp.lt.s32.totalorder %s45_s22, %s45_s22 }
  0x2e   :  { %p1776_p5 = scmp.ne.s32.totalorder %s45_s22, %s1775_s30  ;;  %p1781_p7 = scmp.lt.s32.totalorder %s1775_s30, %s1775_s30 }
  0x30   :  { %p1782_p8 = por %p1781_p7, %p1780_p6 }
  0x32   :  { %p1783_p9 = pnand %p1782_p8, %p1776_p5 }
  0x34   :  { %1786 = shalt.err (!%p1783_p9)
}
  0x35   :  { %s1822_s0 = smov 64   ;;  %s1823_s6 = smov 4  }
  0x36   :  { %50 = dma.hbm_to_vmem [thread:$0]  %s1936_s3, 2048, %s45_s22, [#allocation6], %s1822_s0, %s1822_s0, %s1823_s6  }
  0x37   :  { %1809 = dma.done.wait [#allocation3], 1024  }
  0x38   :  { %1810 = vsyncadd [#allocation3], 4294966272 }
  0x39   :  { %1811 = dma.done.wait [#allocation6], 18432  }
  0x3a   :  { %1812 = vsyncadd [#allocation6], 4294948864  ;;  %v1501_v0 = vld [vmem:[#allocation5 + $0x4] ss:$8 sps:$4 sm:$0xff]   ;;  %v1505_v2 = vld [vmem:[#allocation5] ss:$8 sps:$4 sm:$0xff]   ;;  %v86_v40 = vlaneseq }
  0x3b   :  { %v1503_v1 = vld [vmem:[#allocation5 + $0x204] ss:$8 sps:$4 sm:$0xff]   ;;  %947 = vmatprep.subr.bf16.mxu1 %v1501_v0  ;;  %v1506_v3 = vld [vmem:[#allocation5 + $0x200] ss:$8 sps:$4 sm:$0xff]   ;;  %v1507_v4 = vld [vmem:[#allocation5 + $0x14] ss:$8 sps:$4 sm:$0xff]  }
  0x3c   :  { %1029 = vmatprep.subr.bf16.mxu0 %v1503_v1  ;;  %948 = vmatpush1.bf16.msra.mxu1 %v1505_v2  ;;  %v1509_v5 = vld [vmem:[#allocation5 + $0x214] ss:$8 sps:$4 sm:$0xff]   ;;  %v1511_v6 = vld [vmem:[#allocation5 + $0x10] ss:$8 sps:$4 sm:$0xff]   ;;  %v1513_v8 = vld [vmem:[#allocation5 + $0x24] ss:$8 sps:$4 sm:$0xff]  }
  0x3d   :  { %1030 = vmatpush1.bf16.msra.mxu0 %v1506_v3  ;;  %949 = vmatprep.subr.bf16.mxu1 %v1507_v4  ;;  %v1512_v7 = vld [vmem:[#allocation5 + $0x210] ss:$8 sps:$4 sm:$0xff]   ;;  %v1515_v9 = vld [vmem:[#allocation5 + $0x224] ss:$8 sps:$4 sm:$0xff]   ;;  %v1517_v10 = vld [vmem:[#allocation5 + $0x20] ss:$8 sps:$4 sm:$0xff]  }
  0x3e   :  { %1031 = vmatprep.subr.bf16.mxu0 %v1509_v5  ;;  %v1518_v11 = vld [vmem:[#allocation5 + $0x220] ss:$8 sps:$4 sm:$0xff]   ;;  %v1519_v12 = vld [vmem:[#allocation5 + $0x34] ss:$8 sps:$4 sm:$0xff]   ;;  %v1523_v14 = vld [vmem:[#allocation5 + $0x30] ss:$8 sps:$4 sm:$0xff]  }
  0x3f   :  { %v1521_v13 = vld [vmem:[#allocation5 + $0x234] ss:$8 sps:$4 sm:$0xff]   ;;  %v1524_v15 = vld [vmem:[#allocation5 + $0x230] ss:$8 sps:$4 sm:$0xff]   ;;  %v1525_v16 = vld [vmem:[#allocation5 + $0x44] ss:$8 sps:$4 sm:$0xff]  }
  0x40   :  { %950 = vmatpush1.bf16.msra.mxu1 %v1511_v6  ;;  %v1527_v17 = vld [vmem:[#allocation5 + $0x244] ss:$8 sps:$4 sm:$0xff]   ;;  %v1529_v18 = vld [vmem:[#allocation5 + $0x40] ss:$8 sps:$4 sm:$0xff]   ;;  %v1531_v20 = vld [vmem:[#allocation5 + $0x54] ss:$8 sps:$4 sm:$0xff]  }
  0x41   :  { %1032 = vmatpush1.bf16.msra.mxu0 %v1512_v7  ;;  %951 = vmatprep.subr.bf16.mxu1 %v1513_v8  ;;  %v1530_v19 = vld [vmem:[#allocation5 + $0x240] ss:$8 sps:$4 sm:$0xff]   ;;  %v1533_v21 = vld [vmem:[#allocation5 + $0x254] ss:$8 sps:$4 sm:$0xff]   ;;  %v1535_v22 = vld [vmem:[#allocation5 + $0x50] ss:$8 sps:$4 sm:$0xff]  }
  0x42   :  { %1033 = vmatprep.subr.bf16.mxu0 %v1515_v9  ;;  %v1536_v23 = vld [vmem:[#allocation5 + $0x250] ss:$8 sps:$4 sm:$0xff]   ;;  %v1537_v24 = vld [vmem:[#allocation5 + $0x64] ss:$8 sps:$4 sm:$0xff]   ;;  %v1541_v26 = vld [vmem:[#allocation5 + $0x60] ss:$8 sps:$4 sm:$0xff]  }
  0x43   :  { %v1539_v25 = vld [vmem:[#allocation5 + $0x264] ss:$8 sps:$4 sm:$0xff]   ;;  %v1542_v27 = vld [vmem:[#allocation5 + $0x260] ss:$8 sps:$4 sm:$0xff]   ;;  %v1543_v28 = vld [vmem:[#allocation5 + $0x74] ss:$8 sps:$4 sm:$0xff]  }
  0x44   :  { %952 = vmatpush1.bf16.msra.mxu1 %v1517_v10  ;;  %v1545_v29 = vld [vmem:[#allocation5 + $0x274] ss:$8 sps:$4 sm:$0xff]   ;;  %v1547_v30 = vld [vmem:[#allocation5 + $0x70] ss:$8 sps:$4 sm:$0xff]   ;;  %v1549_v32 = vld [vmem:[#allocation5 + $0x84] ss:$8 sps:$4 sm:$0xff]  }
  0x45   :  { %1034 = vmatpush1.bf16.msra.mxu0 %v1518_v11  ;;  %953 = vmatprep.subr.bf16.mxu1 %v1519_v12  ;;  %v1548_v31 = vld [vmem:[#allocation5 + $0x270] ss:$8 sps:$4 sm:$0xff]   ;;  %v1551_v33 = vld [vmem:[#allocation5 + $0x284] ss:$8 sps:$4 sm:$0xff]   ;;  %v1553_v34 = vld [vmem:[#allocation5 + $0x80] ss:$8 sps:$4 sm:$0xff]  }
  0x46   :  { %1035 = vmatprep.subr.bf16.mxu0 %v1521_v13  ;;  %v1554_v35 = vld [vmem:[#allocation5 + $0x280] ss:$8 sps:$4 sm:$0xff]   ;;  %v1555_v36 = vld [vmem:[#allocation5 + $0x94] ss:$8 sps:$4 sm:$0xff]   ;;  %v1824_v38 = vmov 1983009808  }
  0x47   :  { %v1557_v37 = vld [vmem:[#allocation5 + $0x294] ss:$8 sps:$4 sm:$0xff]   ;;  %v84_v39 = vunpack.c.l.s4 %v1824_v38  ;;  %v1559_v41 = vld [vmem:[#allocation5 + $0x90] ss:$8 sps:$4 sm:$0xff]   ;;  %v1561_v43 = vld [vmem:[#allocation5 + $0xa4] ss:$8 sps:$4 sm:$0xff]  }
  0x48   :  { %954 = vmatpush1.bf16.msra.mxu1 %v1523_v14  ;;  %v1560_v42 = vld [vmem:[#allocation5 + $0x290] ss:$8 sps:$4 sm:$0xff]   ;;  %v1563_v44 = vld [vmem:[#allocation5 + $0x2a4] ss:$8 sps:$4 sm:$0xff]   ;;  %v1894_v46 = vshrl.u32 %v86_v40, 7 }
  0x49   :  { %1036 = vmatpush1.bf16.msra.mxu0 %v1524_v15  ;;  %955 = vmatprep.subr.bf16.mxu1 %v1525_v16  ;;  %v85_v45 = vunpack.c.0.s8 %v84_v39  ;;  %v1565_v47 = vld [vmem:[#allocation5 + $0xa0] ss:$8 sps:$4 sm:$0xff]   ;;  %v1567_v49 = vld [vmem:[#allocation5 + $0xb4] ss:$8 sps:$4 sm:$0xff]   ;;  %v1571_v51 = vld [vmem:[#allocation5 + $0xb0] ss:$8 sps:$4 sm:$0xff]  }
  0x4a   :  { %1037 = vmatprep.subr.bf16.mxu0 %v1527_v17  ;;  %v1566_v48 = vld [vmem:[#allocation5 + $0x2a0] ss:$8 sps:$4 sm:$0xff]   ;;  %v1569_v50 = vld [vmem:[#allocation5 + $0x2b4] ss:$8 sps:$4 sm:$0xff]   ;;  %v1572_v52 = vld [vmem:[#allocation5 + $0x2b0] ss:$8 sps:$4 sm:$0xff]  }
  0x4b   :  { %v88_v53 = vsub.s32 %v85_v45, %v1894_v46  ;;  %v1573_v54 = vld [vmem:[#allocation5 + $0xc4] ss:$8 sps:$4 sm:$0xff]   ;;  %v1597_v55 = vld [vmem:[#allocation2] ss:$16 sps:$4 sm:$0xff]   ;;  %v1579_v62 = vld [vmem:[#allocation5 + $0xd4] ss:$8 sps:$4 sm:$0xff]  }
  0x4c   :  { %956 = vmatpush1.bf16.msra.mxu1 %v1529_v18  ;;  %v1600_v56 = vld [vmem:[#allocation2 + $0x20] ss:$16 sps:$4 sm:$0xff]   ;;  %v1575_v57 = vld [vmem:[#allocation5 + $0x2c4] ss:$8 sps:$4 sm:$0xff]   ;;  %v1606_v0 = vld [vmem:[#allocation2 + $0x8] ss:$16 sps:$4 sm:$0xff]  }
  0x4d   :  { %1038 = vmatpush1.bf16.msra.mxu0 %v1530_v19  ;;  %957 = vmatprep.subr.bf16.mxu1 %v1531_v20  ;;  %v1577_v58 = vld [vmem:[#allocation5 + $0xc0] ss:$8 sps:$4 sm:$0xff]   ;;  %v89_v60 = vrot.slane %v1597_v55, %v88_v53  ;;  %v103_v61 = vrot.slane %v1600_v56, %v88_v53  ;;  %v1581_v2 = vld [vmem:[#allocation5 + $0x2d4] ss:$8 sps:$4 sm:$0xff]   ;;  %v1583_v3 = vld [vmem:[#allocation5 + $0xd0] ss:$8 sps:$4 sm:$0xff]   ;;  %v125_v6 = vrot.slane %v1606_v0, %v88_v53 }
  0x4e   :  { %1039 = vmatprep.subr.bf16.mxu0 %v1533_v21  ;;  %v1578_v59 = vld [vmem:[#allocation5 + $0x2c0] ss:$8 sps:$4 sm:$0xff]   ;;  %v1584_v4 = vld [vmem:[#allocation5 + $0x2d0] ss:$8 sps:$4 sm:$0xff]   ;;  %v1585_v8 = vld [vmem:[#allocation5 + $0xe4] ss:$8 sps:$4 sm:$0xff]  }
  0x4f   :  { %v112_v63 = vcombine.high %v89_v60, %v103_v61  ;;  %v1609_v1 = vld [vmem:[#allocation2 + $0x28] ss:$16 sps:$4 sm:$0xff]   ;;  %v1587_v9 = vld [vmem:[#allocation5 + $0x2e4] ss:$8 sps:$4 sm:$0xff]   ;;  %v1591_v18 = vld [vmem:[#allocation5 + $0xf4] ss:$8 sps:$4 sm:$0xff]  }
  0x50   :  { %958 = vmatpush1.bf16.msra.mxu1 %v1535_v22  ;;  %v139_v7 = vrot.slane %v1609_v1, %v88_v53  ;;  %v1599_v10 = vld [vmem:[#allocation2 + $0x4] ss:$16 sps:$4 sm:$0xff]   ;;  %v1608_v13 = vld [vmem:[#allocation2 + $0xc] ss:$16 sps:$4 sm:$0xff]   ;;  %v1589_v16 = vld [vmem:[#allocation5 + $0xe0] ss:$8 sps:$4 sm:$0xff]  }
  0x51   :  { %1040 = vmatpush1.bf16.msra.mxu0 %v1536_v23  ;;  %959 = vmatprep.subr.bf16.mxu1 %v1537_v24  ;;  %v160_v5 = vpack.c.bf16 %v112_v63, %v112_v63  ;;  %v1602_v12 = vld [vmem:[#allocation2 + $0x24] ss:$16 sps:$4 sm:$0xff]   ;;  %v1611_v14 = vld [vmem:[#allocation2 + $0x2c] ss:$16 sps:$4 sm:$0xff]   ;;  %v1590_v17 = vld [vmem:[#allocation5 + $0x2e0] ss:$8 sps:$4 sm:$0xff]   ;;  %v1897_v20 = vrot.slane %v1599_v10, %v88_v53  ;;  %v1901_v22 = vrot.slane %v1608_v13, %v88_v53 }
  0x52   :  { %1041 = vmatprep.subr.bf16.mxu0 %v1539_v25  ;;  %v148_v11 = vcombine.high %v125_v6, %v139_v7  ;;  %v1593_v19 = vld [vmem:[#allocation5 + $0x2f4] ss:$8 sps:$4 sm:$0xff]   ;;  %v1899_v21 = vrot.slane %v1602_v12, %v88_v53  ;;  %v1903_v23 = vrot.slane %v1611_v14, %v88_v53  ;;  %v1595_v24 = vld [vmem:[#allocation5 + $0xf0] ss:$8 sps:$4 sm:$0xff]   ;;  %v1624_v45 = vld [vmem:[#allocation5 + $0x320] ss:$8 sps:$4 sm:$0xff]  }
  0x53   :  { %979 = vmatprep.mubr.bf16.mxu1 %v160_v5  ;;  %v1596_v25 = vld [vmem:[#allocation5 + $0x2f0] ss:$8 sps:$4 sm:$0xff]   ;;  %v1633_v53 = vld [vmem:[#allocation5 + $0x140] ss:$8 sps:$4 sm:$0xff]   ;;  %v1641_v55 = vld [vmem:[#allocation5 + $0x154] ss:$8 sps:$4 sm:$0xff]  }
  0x54   :  { %960 = vmatpush1.bf16.msra.mxu1 %v1541_v26  ;;  %v164_v15 = vpack.c.bf16 %v148_v11, %v148_v11  ;;  %v111_v26 = vcombine.low %v89_v60, %v103_v61  ;;  %v1615_v40 = vld [vmem:[#allocation5 + $0x110] ss:$8 sps:$4 sm:$0xff]   ;;  %v1644_v56 = vld [vmem:[#allocation5 + $0x354] ss:$8 sps:$4 sm:$0xff]   ;;  %v1650_v60 = vld [vmem:[#allocation5 + $0x364] ss:$8 sps:$4 sm:$0xff]  }
  0x55   :  { %1042 = vmatpush1.bf16.msra.mxu0 %v1542_v27  ;;  %961 = vmatprep.subr.bf16.mxu1 %v1543_v28  ;;  %v147_v27 = vcombine.low %v125_v6, %v139_v7  ;;  %v1605_v28 = vld [vmem:[#allocation5 + $0x104] ss:$8 sps:$4 sm:$0xff]   ;;  %v1645_v61 = vld [vmem:[#allocation5 + $0x160] ss:$8 sps:$4 sm:$0xff]   ;;  %v1653_v63 = vld [vmem:[#allocation5 + $0x174] ss:$8 sps:$4 sm:$0xff]  }
  0x56   :  { %1043 = vmatprep.subr.bf16.mxu0 %v1545_v29  ;;  %1061 = vmatprep.mubr.bf16.mxu0 %v164_v15  ;;  %v1614_v29 = vld [vmem:[#allocation5 + $0x304] ss:$8 sps:$4 sm:$0xff]   ;;  %v1656_v0 = vld [vmem:[#allocation5 + $0x374] ss:$8 sps:$4 sm:$0xff]   ;;  %v1651_v1 = vld [vmem:[#allocation5 + $0x170] ss:$8 sps:$4 sm:$0xff]  }
  0x57   :  { %v1657_v5 = vld [vmem:[#allocation5 + $0x180] ss:$8 sps:$4 sm:$0xff]   ;;  %v1665_v7 = vld [vmem:[#allocation5 + $0x194] ss:$8 sps:$4 sm:$0xff]   ;;  %v1666_v10 = vld [vmem:[#allocation5 + $0x390] ss:$8 sps:$4 sm:$0xff]  }
  0x58   :  { %962 = vmatpush1.bf16.msra.mxu1 %v1547_v30  ;;  %v114_v30 = vcombine.high %v1897_v20, %v1899_v21  ;;  %v1660_v6 = vld [vmem:[#allocation5 + $0x380] ss:$8 sps:$4 sm:$0xff]   ;;  %v1671_v11 = vld [vmem:[#allocation5 + $0x1a4] ss:$8 sps:$4 sm:$0xff]   ;;  %v1677_v15 = vld [vmem:[#allocation5 + $0x1b4] ss:$8 sps:$4 sm:$0xff]  }
  0x59   :  { %1044 = vmatpush1.bf16.msra.mxu0 %v1548_v31  ;;  %963 = vmatprep.subr.bf16.mxu1 %v1549_v32  ;;  %v150_v31 = vcombine.high %v1901_v22, %v1903_v23  ;;  %v1603_v32 = vld [vmem:[#allocation5 + $0x100] ss:$8 sps:$4 sm:$0xff]   ;;  %v1674_v12 = vld [vmem:[#allocation5 + $0x3a4] ss:$8 sps:$4 sm:$0xff]  }
  0x5a   :  { %1045 = vmatprep.subr.bf16.mxu0 %v1551_v33  ;;  %v1612_v33 = vld [vmem:[#allocation5 + $0x300] ss:$8 sps:$4 sm:$0xff]   ;;  %v162_v38 = vpack.c.bf16 %v114_v30, %v114_v30  ;;  %v1690_v30 = vld [vmem:[#allocation5 + $0x3d0] ss:$8 sps:$4 sm:$0xff]  }
  0x5b   :  { %v166_v39 = vpack.c.bf16 %v150_v31, %v150_v31  ;;  %v1669_v13 = vld [vmem:[#allocation5 + $0x1a0] ss:$8 sps:$4 sm:$0xff]   ;;  %v1695_v31 = vld [vmem:[#allocation5 + $0x1e4] ss:$8 sps:$4 sm:$0xff]  }
  0x5c   :  { %964 = vmatpush1.bf16.msra.mxu1 %v1553_v34  ;;  %v159_v34 = vpack.c.bf16 %v111_v26, %v111_v26  ;;  %v1672_v14 = vld [vmem:[#allocation5 + $0x3a0] ss:$8 sps:$4 sm:$0xff]  }
  0x5d   :  { %1046 = vmatpush1.bf16.msra.mxu0 %v1554_v35  ;;  %965 = vmatprep.subr.bf16.mxu1 %v1555_v36  ;;  %v163_v35 = vpack.c.bf16 %v147_v27, %v147_v27  ;;  %v1617_v36 = vld [vmem:[#allocation5 + $0x114] ss:$8 sps:$4 sm:$0xff]   ;;  %v1684_v26 = vld [vmem:[#allocation5 + $0x3c0] ss:$8 sps:$4 sm:$0xff]  }
  0x5e   :  { %1047 = vmatprep.subr.bf16.mxu0 %v1557_v37  ;;  %v1620_v37 = vld [vmem:[#allocation5 + $0x314] ss:$8 sps:$4 sm:$0xff]  }
  0x5f   :  { %v1689_v27 = vld [vmem:[#allocation5 + $0x1d4] ss:$8 sps:$4 sm:$0xff]  }
  0x60   :  { %966 = vmatpush1.bf16.msra.mxu1 %v1559_v41  ;;  %v1618_v41 = vld [vmem:[#allocation5 + $0x310] ss:$8 sps:$4 sm:$0xff]  }
  0x61   :  { %1048 = vmatpush1.bf16.msra.mxu0 %v1560_v42  ;;  %967 = vmatprep.subr.bf16.mxu1 %v1561_v43  ;;  %v1623_v42 = vld [vmem:[#allocation5 + $0x124] ss:$8 sps:$4 sm:$0xff]  }
  0x62   :  { %1049 = vmatprep.subr.bf16.mxu0 %v1563_v44  ;;  %v1626_v43 = vld [vmem:[#allocation5 + $0x324] ss:$8 sps:$4 sm:$0xff]   ;;  %v1621_v44 = vld [vmem:[#allocation5 + $0x120] ss:$8 sps:$4 sm:$0xff]  }
  0x64   :  { %968 = vmatpush1.bf16.msra.mxu1 %v1565_v47  ;;  %v1629_v47 = vld [vmem:[#allocation5 + $0x134] ss:$8 sps:$4 sm:$0xff]  }
  0x65   :  { %1050 = vmatpush1.bf16.msra.mxu0 %v1566_v48  ;;  %969 = vmatprep.subr.bf16.mxu1 %v1567_v49  ;;  %v1632_v48 = vld [vmem:[#allocation5 + $0x334] ss:$8 sps:$4 sm:$0xff]   ;;  %v1627_v49 = vld [vmem:[#allocation5 + $0x130] ss:$8 sps:$4 sm:$0xff]  }
  0x66   :  { %1051 = vmatprep.subr.bf16.mxu0 %v1569_v50  ;;  %v1630_v50 = vld [vmem:[#allocation5 + $0x330] ss:$8 sps:$4 sm:$0xff]  }
  0x68   :  { %970 = vmatpush1.bf16.msra.mxu1 %v1571_v51  ;;  %v1635_v51 = vld [vmem:[#allocation5 + $0x144] ss:$8 sps:$4 sm:$0xff]  }
  0x69   :  { %1052 = vmatpush1.bf16.msra.mxu0 %v1572_v52  ;;  %971 = vmatprep.subr.bf16.mxu1 %v1573_v54  ;;  %v1638_v52 = vld [vmem:[#allocation5 + $0x344] ss:$8 sps:$4 sm:$0xff]   ;;  %v1636_v54 = vld [vmem:[#allocation5 + $0x340] ss:$8 sps:$4 sm:$0xff]  }
  0x6a   :  { %1053 = vmatprep.subr.bf16.mxu0 %v1575_v57  ;;  %v1639_v57 = vld [vmem:[#allocation5 + $0x150] ss:$8 sps:$4 sm:$0xff]  }
  0x6c   :  { %972 = vmatpush1.bf16.msra.mxu1 %v1577_v58  ;;  %v1642_v58 = vld [vmem:[#allocation5 + $0x350] ss:$8 sps:$4 sm:$0xff]  }
  0x6d   :  { %1054 = vmatpush1.bf16.msra.mxu0 %v1578_v59  ;;  %973 = vmatprep.subr.bf16.mxu1 %v1579_v62  ;;  %v1647_v59 = vld [vmem:[#allocation5 + $0x164] ss:$8 sps:$4 sm:$0xff]   ;;  %v1648_v62 = vld [vmem:[#allocation5 + $0x360] ss:$8 sps:$4 sm:$0xff]  }
  0x6e   :  { %1055 = vmatprep.subr.bf16.mxu0 %v1581_v2  ;;  %v1654_v2 = vld [vmem:[#allocation5 + $0x370] ss:$8 sps:$4 sm:$0xff]  }
  0x70   :  { %974 = vmatpush1.bf16.msra.mxu1 %v1583_v3  ;;  %v1659_v3 = vld [vmem:[#allocation5 + $0x184] ss:$8 sps:$4 sm:$0xff]  }
  0x71   :  { %1056 = vmatpush1.bf16.msra.mxu0 %v1584_v4  ;;  %975 = vmatprep.subr.bf16.mxu1 %v1585_v8  ;;  %v1662_v4 = vld [vmem:[#allocation5 + $0x384] ss:$8 sps:$4 sm:$0xff]   ;;  %v1668_v8 = vld [vmem:[#allocation5 + $0x394] ss:$8 sps:$4 sm:$0xff]  }
  0x72   :  { %1057 = vmatprep.subr.bf16.mxu0 %v1587_v9  ;;  %v1663_v9 = vld [vmem:[#allocation5 + $0x190] ss:$8 sps:$4 sm:$0xff]  }
  0x74   :  { %976 = vmatpush1.bf16.msra.mxu1 %v1589_v16  ;;  %v1680_v16 = vld [vmem:[#allocation5 + $0x3b4] ss:$8 sps:$4 sm:$0xff]  }
  0x75   :  { %1058 = vmatpush1.bf16.msra.mxu0 %v1590_v17  ;;  %977 = vmatprep.subr.bf16.mxu1 %v1591_v18  ;;  %v1675_v17 = vld [vmem:[#allocation5 + $0x1b0] ss:$8 sps:$4 sm:$0xff]  }
  0x76   :  { %1059 = vmatprep.subr.bf16.mxu0 %v1593_v19  ;;  %v1678_v18 = vld [vmem:[#allocation5 + $0x3b0] ss:$8 sps:$4 sm:$0xff]   ;;  %v1683_v19 = vld [vmem:[#allocation5 + $0x1c4] ss:$8 sps:$4 sm:$0xff]  }
  0x78   :  { %978 = vmatpush1.bf16.msra.mxu1 %v1595_v24  ;;  %v1686_v24 = vld [vmem:[#allocation5 + $0x3c4] ss:$8 sps:$4 sm:$0xff]  }
  0x79   :  { %1060 = vmatpush1.bf16.msra.mxu0 %v1596_v25  ;;  %988 = vmatprep.subr.bf16.mxu1 %v1605_v28  ;;  %v1681_v25 = vld [vmem:[#allocation5 + $0x1c0] ss:$8 sps:$4 sm:$0xff]   ;;  %v1692_v28 = vld [vmem:[#allocation5 + $0x3d4] ss:$8 sps:$4 sm:$0xff]  }
  0x7a   :  { %1070 = vmatprep.subr.bf16.mxu0 %v1614_v29  ;;  %v1687_v29 = vld [vmem:[#allocation5 + $0x1d0] ss:$8 sps:$4 sm:$0xff]  }
  0x7b   :  { %980 = vmatmul.mubr.bf16.vlgmr.msra.gmra.mrb[0].mxu1 %v159_v34  ;;  %v1696_v34 = vld [vmem:[#allocation5 + $0x3e0] ss:$8 sps:$4 sm:$0xff]  }
  0x7c   :  { %1062 = vmatmul.mubr.bf16.vlgmr.msra.gmra.mrb[0].mxu0 %v163_v35  ;;  %989 = vmatpush1.bf16.msra.mxu1 %v1603_v32  ;;  %v1698_v32 = vld [vmem:[#allocation5 + $0x3e4] ss:$8 sps:$4 sm:$0xff]   ;;  %v1701_v35 = vld [vmem:[#allocation5 + $0x1f4] ss:$8 sps:$4 sm:$0xff]  }
  0x7d   :  { %1071 = vmatpush1.bf16.msra.mxu0 %v1612_v33  ;;  %990 = vmatprep.subr.bf16.mxu1 %v1617_v36  ;;  %v1693_v33 = vld [vmem:[#allocation5 + $0x1e0] ss:$8 sps:$4 sm:$0xff]   ;;  %v1704_v36 = vld [vmem:[#allocation5 + $0x3f4] ss:$8 sps:$4 sm:$0xff]  }
  0x7e   :  { %1072 = vmatprep.subr.bf16.mxu0 %v1620_v37  ;;  %1020 = vmatprep.mubr.bf16.mxu1 %v162_v38  ;;  %v113_v37 = vcombine.low %v1897_v20, %v1899_v21  ;;  %v149_v38 = vcombine.low %v1901_v22, %v1903_v23  ;;  %v1708_v20 = vld [vmem:[#allocation7 + $0x8] sm:$0xff]   ;;  %v1709_v21 = vld [vmem:[#allocation7 + $0x50] sm:$0xff]   ;;  %v1711_v23 = vld [vmem:[#allocation7 + $0x58] sm:$0xff]  }
  0x7f   :  { %1102 = vmatprep.mubr.bf16.mxu0 %v166_v39  ;;  %v1699_v39 = vld [vmem:[#allocation5 + $0x1f0] ss:$8 sps:$4 sm:$0xff]  }
  0x80   :  { %991 = vmatpush1.bf16.msra.mxu1 %v1615_v40  ;;  %v1702_v40 = vld [vmem:[#allocation5 + $0x3f0] ss:$8 sps:$4 sm:$0xff]  }
  0x81   :  { %1073 = vmatpush1.bf16.msra.mxu0 %v1618_v41  ;;  %992 = vmatprep.subr.bf16.mxu1 %v1623_v42  ;;  %v1705_v41 = vld [vmem:[#allocation7 + $0x40] sm:$0xff]   ;;  %v161_v42 = vpack.c.bf16 %v113_v37, %v113_v37  ;;  %v1710_v22 = vld [vmem:[#allocation7 + $0x10] sm:$0xff]  }
  0x82   :  { %1074 = vmatprep.subr.bf16.mxu0 %v1626_v43  ;;  %v165_v43 = vpack.c.bf16 %v149_v38, %v149_v38 }
  0x84   :  { %993 = vmatpush1.bf16.msra.mxu1 %v1621_v44  ;;  %v1706_v44 = vld [vmem:[#allocation7] sm:$0xff]  }
  0x85   :  { %1075 = vmatpush1.bf16.msra.mxu0 %v1624_v45  ;;  %994 = vmatprep.subr.bf16.mxu1 %v1629_v47  ;;  %v1707_v45 = vld [vmem:[#allocation7 + $0x48] sm:$0xff]   ;;  %v1712_v47 = vld [vmem:[#allocation7 + $0x18] sm:$0xff]  }
  0x86   :  { %1076 = vmatprep.subr.bf16.mxu0 %v1632_v48  ;;  %v1713_v48 = vld [vmem:[#allocation7 + $0x60] sm:$0xff]  }
  0x88   :  { %995 = vmatpush1.bf16.msra.mxu1 %v1627_v49  ;;  %v1714_v49 = vld [vmem:[#allocation7 + $0x20] sm:$0xff]  }
  0x89   :  { %1077 = vmatpush1.bf16.msra.mxu0 %v1630_v50  ;;  %996 = vmatprep.subr.bf16.mxu1 %v1635_v51  ;;  %v1715_v50 = vld [vmem:[#allocation7 + $0x68] sm:$0xff]  }
  0x8a   :  { %1078 = vmatprep.subr.bf16.mxu0 %v1638_v52  ;;  %v1716_v51 = vld [vmem:[#allocation7 + $0x28] sm:$0xff]   ;;  %v1717_v52 = vld [vmem:[#allocation7 + $0x70] sm:$0xff]  }
  0x8c   :  { %997 = vmatpush1.bf16.msra.mxu1 %v1633_v53  ;;  %v1718_v53 = vld [vmem:[#allocation7 + $0x30] sm:$0xff]  }
  0x8d   :  { %1079 = vmatpush1.bf16.msra.mxu0 %v1636_v54  ;;  %998 = vmatprep.subr.bf16.mxu1 %v1641_v55  ;;  %v1719_v54 = vld [vmem:[#allocation7 + $0x78] sm:$0xff]  }
  0x8e   :  { %1080 = vmatprep.subr.bf16.mxu0 %v1644_v56  ;;  %v1720_v55 = vld [vmem:[#allocation7 + $0x38] sm:$0xff]   ;;  %v299_v56 = vsub.s32 0, %v1894_v46 }
  0x90   :  { %999 = vmatpush1.bf16.msra.mxu1 %v1639_v57  ;;  %v295_v57 = vld [vmem:[%s1935_s2] sm:$0x3] }
  0x91   :  { %1081 = vmatpush1.bf16.msra.mxu0 %v1642_v58  ;;  %1000 = vmatprep.subr.bf16.mxu1 %v1647_v59  ;;  %v303_v58 = vsub.s32 1, %v1894_v46  ;;  %v300_v59 = vrot.slane %v295_v57, %v299_v56 }
  0x92   :  { %1082 = vmatprep.subr.bf16.mxu0 %v1650_v60 }
  0x93   :  { %v304_v60 = vrot.slane %v295_v57, %v303_v58 }
  0x94   :  { %1001 = vmatpush1.bf16.msra.mxu1 %v1645_v61 }
  0x95   :  { %1083 = vmatpush1.bf16.msra.mxu0 %v1648_v62  ;;  %1002 = vmatprep.subr.bf16.mxu1 %v1653_v63 }
  0x96   :  { %1084 = vmatprep.subr.bf16.mxu0 %v1656_v0 }
  0x98   :  { %1003 = vmatpush1.bf16.msra.mxu1 %v1651_v1 }
  0x99   :  { %1085 = vmatpush1.bf16.msra.mxu0 %v1654_v2  ;;  %1004 = vmatprep.subr.bf16.mxu1 %v1659_v3 }
  0x9a   :  { %1086 = vmatprep.subr.bf16.mxu0 %v1662_v4 }
  0x9c   :  { %1005 = vmatpush1.bf16.msra.mxu1 %v1657_v5 }
  0x9d   :  { %1087 = vmatpush1.bf16.msra.mxu0 %v1660_v6  ;;  %1006 = vmatprep.subr.bf16.mxu1 %v1665_v7 }
  0x9e   :  { %1088 = vmatprep.subr.bf16.mxu0 %v1668_v8 }
  0xa0   :  { %1007 = vmatpush1.bf16.msra.mxu1 %v1663_v9 }
  0xa1   :  { %1089 = vmatpush1.bf16.msra.mxu0 %v1666_v10  ;;  %1008 = vmatprep.subr.bf16.mxu1 %v1671_v11 }
  0xa2   :  { %1090 = vmatprep.subr.bf16.mxu0 %v1674_v12 }
  0xa4   :  { %1009 = vmatpush1.bf16.msra.mxu1 %v1669_v13  ;;  %v1437_v13 = vld [vmem:[%s1937_s4] ss:$0 sm:$0xff] }
  0xa5   :  { %1091 = vmatpush1.bf16.msra.mxu0 %v1672_v14  ;;  %1010 = vmatprep.subr.bf16.mxu1 %v1677_v15 }
  0xa6   :  { %1092 = vmatprep.subr.bf16.mxu0 %v1680_v16 }
  0xa8   :  { %1011 = vmatpush1.bf16.msra.mxu1 %v1675_v17 }
  0xa9   :  { %1093 = vmatpush1.bf16.msra.mxu0 %v1678_v18  ;;  %1012 = vmatprep.subr.bf16.mxu1 %v1683_v19 }
  0xaa   :  { %1094 = vmatprep.subr.bf16.mxu0 %v1686_v24 }
  0xac   :  { %1013 = vmatpush1.bf16.msra.mxu1 %v1681_v25 }
  0xad   :  { %1095 = vmatpush1.bf16.msra.mxu0 %v1684_v26  ;;  %1014 = vmatprep.subr.bf16.mxu1 %v1689_v27 }
  0xae   :  { %1096 = vmatprep.subr.bf16.mxu0 %v1692_v28 }
  0xb0   :  { %1015 = vmatpush1.bf16.msra.mxu1 %v1687_v29 }
  0xb1   :  { %1097 = vmatpush1.bf16.msra.mxu0 %v1690_v30  ;;  %1016 = vmatprep.subr.bf16.mxu1 %v1695_v31 }
  0xb2   :  { %1098 = vmatprep.subr.bf16.mxu0 %v1698_v32 }
  0xb4   :  { %1017 = vmatpush1.bf16.msra.mxu1 %v1693_v33 }
  0xb5   :  { %1099 = vmatpush1.bf16.msra.mxu0 %v1696_v34  ;;  %1018 = vmatprep.subr.bf16.mxu1 %v1701_v35 }
  0xb6   :  { %1100 = vmatprep.subr.bf16.mxu0 %v1704_v36 }
  0xb8   :  { %1019 = vmatpush1.bf16.msra.mxu1 %v1699_v39 }
  0xb9   :  { %1101 = vmatpush1.bf16.msra.mxu0 %v1702_v40  ;;  %1454 = vmatprep.subr.bf16.mxu1 %v1705_v41 }
  0xbb   :  { %1021 = vmatmul.mubr.bf16.vlgmr.msra.gmra.mrb[0].mxu1 %v161_v42 }
  0xbc   :  { %1103 = vmatmul.mubr.bf16.vlgmr.msra.gmra.mrb[0].mxu0 %v165_v43  ;;  %1455 = vmatpush3.bf16.msra.mxu1 %v1706_v44 }
  0xbd   :  { %1456 = vmatprep.subr.bf16.mxu1 %v1707_v45 }
  0xc0   :  { %1457 = vmatpush3.bf16.msra.mxu1 %v1708_v20 }
  0xc1   :  { %1458 = vmatprep.subr.bf16.mxu1 %v1709_v21 }
  0xc4   :  { %1459 = vmatpush3.bf16.msra.mxu1 %v1710_v22 }
  0xc5   :  { %1460 = vmatprep.subr.bf16.mxu1 %v1711_v23 }
  0xc8   :  { %1461 = vmatpush3.bf16.msra.mxu1 %v1712_v47 }
  0xc9   :  { %1462 = vmatprep.subr.bf16.mxu1 %v1713_v48 }
  0xcc   :  { %1463 = vmatpush3.bf16.msra.mxu1 %v1714_v49 }
  0xcd   :  { %1464 = vmatprep.subr.bf16.mxu1 %v1715_v50 }
  0xd0   :  { %1465 = vmatpush3.bf16.msra.mxu1 %v1716_v51 }
  0xd1   :  { %1466 = vmatprep.subr.bf16.mxu1 %v1717_v52 }
  0xd4   :  { %1467 = vmatpush3.bf16.msra.mxu1 %v1718_v53 }
  0xd5   :  { %1468 = vmatprep.subr.bf16.mxu1 %v1719_v54 }
  0xd8   :  { %1469 = vmatpush3.bf16.msra.mxu1 %v1720_v55 }
 0x18e   :  { %v1022_v61 = vpop.f32.mrb[0].mxu1 }
 0x18f   :  { %v1104_v62 = vpop.f32.mrb[0].mxu0  ;;  %v1476_v63 = vadd.f32 %v1022_v61, %v300_v59  ;;  %v1024_v0 = vpop.f32.mrb[1].mxu1 }
 0x190   :  { %v1106_v1 = vpop.f32.mrb[1].mxu0  ;;  %v1478_v2 = vadd.f32 %v1024_v0, %v304_v60  ;;  %v1026_v3 = vpop.f32.mrb[2].mxu1 }
 0x191   :  { %v1108_v4 = vpop.f32.mrb[2].mxu0  ;;  %v1477_v5 = vadd.f32 %v1476_v63, %v1104_v62  ;;  %v1027_v6 = vpop.f32.mrb[3].mxu1 }
 0x192   :  { %v1109_v7 = vpop.f32.mrb[3].mxu0  ;;  %v1479_v8 = vadd.f32 %v1478_v2, %v1106_v1 }
 0x193   :  { %v1111_v9 = vmax.f32 %v1477_v5, 0.0 }
 0x194   :  { %v1112_v10 = vmax.f32 %v1479_v8, 0.0 }
 0x195   :  { %v1113_v12 = vpack.c.bf16 %v1111_v9, %v1111_v9 }
 0x196   :  { %v1114_v11 = vpack.c.bf16 %v1112_v10, %v1112_v10 }
 0x198   :  { %1282 = vmatprep.mubr.bf16.mxu1 %v1114_v11 }
 0x199   :  { %1283 = vmatmul.mubr.bf16.vlgmr.msra.gmra.mrb[4].mxu1 %v1113_v12 }
 0x26c   :  { %v1470_v46 = vpop.f32.mrb[4].mxu1 }
 0x26d   :  { %v1471_v14 = vpop.f32.mrb[5].mxu1 }
 0x26e   :  { %v1472_v15 = vadd.f32 %v1471_v14, %v1470_v46  ;;  %v1473_v16 = vpop.f32.mrb[6].mxu1 }
 0x26f   :  { %v1474_v17 = vpop.f32.mrb[7].mxu1 }
 0x270   :  { %v1285_v18 = vadd.f32 %v1472_v15, %v1437_v13 }
 0x272   :  { %1290 = vst [vmem:[#allocation8] sm:$0xff] %v1285_v18 }
 0x273   :  { %1295 = vsyncadd [#allocation4], 96  ;;  %s1825_s11 = smov [#allocation8]  }
 0x274   :  { %s1296_s12 = sshll.u32 %s1825_s11, 4  ;;  %s1297_s12 = int_to_ptr.vmem [resolvable:$true] %s1296_s12 }
 0x275   :  { %s1787_s13 = scalar_lea.vmem %s1297_s12, 32  ;;  %s1791_s14 = scalar_lea.vmem %s1297_s12, 128 }
 0x276   :  { %p1788_p10 = scmp.ne.s32.totalorder %s1297_s12, %s1787_s13  ;;  %p1792_p11 = scmp.lt.s32.totalorder %s1297_s12, %s1297_s12 }
 0x277   :  { %p1793_p12 = scmp.lt.s32.totalorder %s1791_s14, %s1787_s13 }
 0x279   :  { %p1794_p13 = por %p1793_p12, %p1792_p11 }
 0x27b   :  { %p1795_p0 = pnand %p1794_p13, %p1788_p10 }
 0x27d   :  { %1798 = shalt.err (!%p1795_p0)
}
 0x27e   :  { %s1799_s16 = scalar_lea.hbm %s1938_s5, 32 }
 0x27f   :  { %p1800_p1 = scmp.ne.s32.totalorder %s1938_s5, %s1799_s16  ;;  %p1803_p2 = scmp.lt.u32.totalorder %s1799_s16, %s1938_s5 }
 0x281   :  { %p1805_p3 = pnand %p1803_p2, %p1800_p1 }
 0x283   :  { %1808 = shalt.err (!%p1805_p3)
}
 0x284   :  { %s1826_s20 = smov 32   ;;  %s1827_s21 = smov 2  }
 0x285   :  { %1302 = dma.vmem_to_hbm [thread:$0]  %s1297_s12, 32, %s1938_s5, [#allocation4], %s1826_s20, %s1826_s20, %s1827_s21  }
 0x286   :  { %1813 = dma.done.wait [#allocation4], 128  }
 0x287   :  { %1814 = vsyncadd [#allocation4], 4294967168 }
 0x288   :  { %1306 = vsyncpa [#allocation3], 1 }
 0x289   :  { %1307 = vsyncpa [#allocation6], 1 }
 0x28a   :  { %1308 = vsyncpa [#allocation4], 1 }

</bundles_post_ra>
